<compile_context>
chip_gen: v7x
topology: tpu7x:2x2x1
jax: 0.10.0
libtpu: 0.0.40
codegen_flags: <defaults>
</compile_context>

<pallas_src>
import functools

import jax
import jax.numpy as jnp
from jax import lax
from jax.experimental import pallas as pl
from jax.experimental.pallas import tpu as pltpu

INT_DIM = 25     # intermediate Linear width from the PyTorch module
_LANE = 128
_SUBLANE = 8


def _round_up(x, m):
    return (x + m - 1) // m * m


# --------------------------------------------------------------------------- #
# Kernel
# --------------------------------------------------------------------------- #
def autoencoder_kernel(x_ref,
                       w1_ref, b1_ref,     # enc Linear1: [D_in, INT_PAD], [1, INT_PAD]
                       wst_ref, bst_ref,   # stacked (W23 | W2): [INT_PAD, INT_PAD+hid]
                       w4_ref, b4_ref,     # dec Linear2: [INT_PAD, D_in], [1, D_in]
                       enc_ref, dec_ref,
                       *, precision):
    int_pad = w4_ref.shape[0]

    x = x_ref[...]                                                    # [bt, D_in]

    # encoder Linear1 + ReLU.  MXU operands stay in the I/O dtype; bias add
    # and ReLU are done in f32 (cheap everywhere, avoids bf16 VPU work on v5e).
    h1 = jnp.dot(x, w1_ref[...],
                 preferred_element_type=jnp.float32, precision=precision)
    h1 = jnp.maximum(h1 + b1_ref[...], 0.0)                           # [bt, INT_PAD] f32

    # One matmul produces BOTH the encoder output (`encoded`) and the fused
    # enc.L2 -> dec.L1 pre-activation (no ReLU between those two Linears, so
    # W23 = W3@W2 and b23 = W3@b2 + b3 were folded in pack_params).
    comb = jnp.dot(h1.astype(wst_ref.dtype), wst_ref[...],
                   preferred_element_type=jnp.float32,
                   precision=precision) + bst_ref[...]                # [bt, INT_PAD+hid]
    enc = comb[:, int_pad:]                                           # [bt, hidden]
    h2 = jnp.maximum(comb[:, :int_pad], 0.0)                          # [bt, INT_PAD]

    # decoder Linear2
    dec = jnp.dot(h2.astype(w4_ref.dtype), w4_ref[...],
                  preferred_element_type=jnp.float32,
                  precision=precision) + b4_ref[...]                  # [bt, D_in]

    enc_ref[...] = enc.astype(enc_ref.dtype)
    dec_ref[...] = dec.astype(dec_ref.dtype)


# --------------------------------------------------------------------------- #
# Tile-size heuristic (review items 2-5)
# --------------------------------------------------------------------------- #
def _pick_batch_tile(B, input_dim, hidden_dim, io_itemsize,
                     target_step_bytes=2 << 20,
                     vmem_budget_bytes=32 << 20):
    """Pick the batch tile:
      * each grid step should stream >= ~2 MiB of HBM traffic so the ~0.35us
        per-step overhead is amortized;
      * the double-buffered (lane-padded) x/enc/dec pipeline blocks plus f32
        intermediates must fit a VMEM budget safe on v7x (64 MiB physical);
      * keep >= 2 grid steps for large batches so the 'parallel' axis can be
        sharded across v7x's two TensorCores (no cost on v5e/v6e)."""
    if B <= 2 * _LANE:
        return B                                   # tiny batch: one full block
    lane_pad = lambda n: _round_up(n, _LANE)
    row_hbm = io_itemsize * (2 * input_dim + hidden_dim)           # x + dec + enc
    row_vmem = (2 * io_itemsize * (2 * lane_pad(input_dim) + lane_pad(hidden_dim))
                + 4 * 4 * lane_pad(INT_DIM))       # f32 h1/comb/h2/dec intermediates
    bt = max(target_step_bytes // row_hbm, 4 * _LANE)
    bt = min(bt, max(_LANE, vmem_budget_bytes // row_vmem))
    bt = min(bt, -(-B // 2))                       # >= 2 steps -> both v7x cores busy
    return max(_LANE, (bt // _LANE) * _LANE)


# --------------------------------------------------------------------------- #
# Wrapper
# --------------------------------------------------------------------------- #
def autoencoder_forward(x, packed, *, batch_tile=None):
    """x: [B, input_dim] (ideally already in packed dtype). Returns (encoded, decoded)."""
    w1, b1 = packed["w1"], packed["b1"]
    wst, bst = packed["wst"], packed["bst"]
    w4, b4 = packed["w4"], packed["b4"]
    io_dtype = w1.dtype
    int_pad, input_dim = w4.shape
    hidden_dim = wst.shape[1] - int_pad
    B = x.shape[0]
    assert x.shape[1] == input_dim

    if x.dtype != io_dtype:
        # Fallback only: ideally the caller supplies x already in the I/O dtype
        # (a wrapper cast is one extra HBM pass over x).
        x = x.astype(io_dtype)

    bt = batch_tile or _pick_batch_tile(B, input_dim, hidden_dim,
                                        jnp.dtype(io_dtype).itemsize)
    grid = (pl.cdiv(B, bt),)     # no padding of B; final partial tile is masked

    precision = lax.Precision.HIGHEST if io_dtype == jnp.float32 else None
    kernel = functools.partial(autoencoder_kernel, precision=precision)

    const = lambda shape: pl.BlockSpec(shape, lambda i: (0, 0))  # resident weights
    in_specs = [
        pl.BlockSpec((bt, input_dim), lambda i: (i, 0)),         # x tile (natural layout)
        const(w1.shape), const(b1.shape),
        const(wst.shape), const(bst.shape),
        const(w4.shape), const(b4.shape),
    ]
    out_specs = [
        pl.BlockSpec((bt, hidden_dim), lambda i: (i, 0)),        # encoded tile
        pl.BlockSpec((bt, input_dim), lambda i: (i, 0)),         # decoded tile
    ]
    out_shape = [
        jax.ShapeDtypeStruct((B, hidden_dim), io_dtype),
        jax.ShapeDtypeStruct((B, input_dim), io_dtype),
    ]

    # TODO(synk): for very wide features (input_dim >~ 4K) add a second grid
    # axis tiling input_dim (accumulate W1's K-contraction in a VMEM scratch
    # and tile W4's output columns) so the tiles still fit v7x's 64 MiB VMEM.
    enc, dec = pl.pallas_call(
        kernel,
        grid_spec=pltpu.PrefetchScalarGridSpec(
            num_scalar_prefetch=0, grid=grid,
            in_specs=in_specs, out_specs=out_specs),
        out_shape=out_shape,
        compiler_params=pltpu.CompilerParams(
            dimension_semantics=("parallel",),
            vmem_limit_bytes=48 * 1024 * 1024),
    )(x, w1, b1, wst, bst, w4, b4)
    return enc, dec


# --------------------------------------------------------------------------- #
# Parameters
# --------------------------------------------------------------------------- #
def init_params(key, input_dim, hidden_dim=2, int_dim=INT_DIM):
    """PyTorch-layout params: W [out_features, in_features], b [out_features]."""
    ks = jax.random.split(key, 8)

    def linear(kw, kb, fan_in, fan_out):
        bound = 1.0 / jnp.sqrt(jnp.float32(fan_in))
        w = jax.random.uniform(kw, (fan_out, fan_in), jnp.float32, -bound, bound)
        b = jax.random.uniform(kb, (fan_out,), jnp.float32, -bound, bound)
        return w, b

    W1, b1 = linear(ks[0], ks[1], input_dim, int_dim)    # [25, D]
    W2, b2 = linear(ks[2], ks[3], int_dim, hidden_dim)   # [2, 25]
    W3, b3 = linear(ks[4], ks[5], hidden_dim, int_dim)   # [25, 2]
    W4, b4 = linear(ks[6], ks[7], int_dim, input_dim)    # [D, 25]
    return {"W1": W1, "b1": b1, "W2": W2, "b2": b2,
            "W3": W3, "b3": b3, "W4": W4, "b4": b4}


def pack_params(raw, dtype=jnp.float32):
    """Pack PyTorch params for the kernel: natural [in, out] orientation,
    int_dim zero-padded to 32 (NOT 128 - DMA-bound), enc.L2/dec.L1 folded and
    the encoder head stacked next to the fold; weights in `dtype`, biases f32."""
    W1, b1 = raw["W1"], raw["b1"]
    W2, b2 = raw["W2"], raw["b2"]
    W3, b3 = raw["W3"], raw["b3"]
    W4, b4 = raw["W4"], raw["b4"]
    int_dim, input_dim = W1.shape
    hidden_dim = W2.shape[0]
    int_pad = _round_up(int_dim, _SUBLANE)               # 25 -> 32
    hi = lax.Precision.HIGHEST

    w1p = jnp.zeros((input_dim, int_pad), jnp.float32).at[:, :int_dim].set(W1.T)
    b1p = jnp.zeros((1, int_pad), jnp.float32).at[0, :int_dim].set(b1)

    # fold: h2_pre = (h1 @ W2^T + b2) @ W3^T + b3 = h1 @ (W3 W2)^T + (W3 b2 + b3)
    W23 = jnp.dot(W3, W2, precision=hi)                  # [25, 25]
    b23 = jnp.dot(W3, b2, precision=hi) + b3             # [25]

    wst = jnp.zeros((int_pad, int_pad + hidden_dim), jnp.float32)
    wst = wst.at[:int_dim, :int_dim].set(W23.T)          # -> decoder hidden pre-act
    wst = wst.at[:int_dim, int_pad:].set(W2.T)           # -> `encoded` output
    bst = jnp.zeros((1, int_pad + hidden_dim), jnp.float32)
    bst = bst.at[0, :int_dim].set(b23)
    bst = bst.at[0, int_pad:].set(b2)

    w4p = jnp.zeros((int_pad, input_dim), jnp.float32).at[:int_dim, :].set(W4.T)
    b4p = b4.reshape(1, input_dim).astype(jnp.float32)

    cast_w = lambda a: a.astype(dtype)
    return {"w1": cast_w(w1p), "b1": b1p,
            "wst": cast_w(wst), "bst": bst,
            "w4": cast_w(w4p), "b4": b4p}


def reference_forward(x, raw):
    hi = lax.Precision.HIGHEST
    h1 = jnp.maximum(jnp.dot(x, raw["W1"].T, precision=hi) + raw["b1"], 0.0)
    enc = jnp.dot(h1, raw["W2"].T, precision=hi) + raw["b2"]
    h2 = jnp.maximum(jnp.dot(enc, raw["W3"].T, precision=hi) + raw["b3"], 0.0)
    dec = jnp.dot(h2, raw["W4"].T, precision=hi) + raw["b4"]
    return enc, dec


# --------------------------------------------------------------------------- #
# Self-test
# --------------------------------------------------------------------------- #
if __name__ == "__main__":
    key = jax.random.PRNGKey(0)
    k_x, k_p = jax.random.split(key)

    B = 16           # batch (number of hyperedges)
    input_dim = 16   # edge feature dimension (edge_feat.shape[-1])
    hidden_dim = 2

    x = jax.random.normal(k_x, (B, input_dim), jnp.float32)
    raw = init_params(k_p, input_dim, hidden_dim, INT_DIM)
    enc_ref, dec_ref = reference_forward(x, raw)

    # ---- f32 path (strict check) ----
    packed = pack_params(raw, dtype=jnp.float32)
    enc, dec = autoencoder_forward(x, packed)
    enc, dec = jax.block_until_ready((enc, dec))
    assert enc.shape == (B, hidden_dim) and dec.shape == (B, input_dim)
    assert jnp.allclose(enc, enc_ref, atol=1e-4, rtol=1e-4)
    assert jnp.allclose(dec, dec_ref, atol=1e-4, rtol=1e-4)

    # ---- bf16 I/O path (bandwidth-optimized; looser tolerance) ----
    packed_bf16 = pack_params(raw, dtype=jnp.bfloat16)
    enc16, dec16 = autoencoder_forward(x.astype(jnp.bfloat16), packed_bf16)
    enc16, dec16 = jax.block_until_ready((enc16, dec16))
    assert enc16.shape == (B, hidden_dim) and dec16.shape == (B, input_dim)
    assert jnp.allclose(enc16.astype(jnp.float32), enc_ref, atol=5e-2, rtol=5e-2)
    assert jnp.allclose(dec16.astype(jnp.float32), dec_ref, atol=5e-2, rtol=5e-2)

    print("KERNEL_OK")
</pallas_src>

<mosaic_0001>
module attributes {stable_mosaic.version = 11 : i64} {
  func.func @autoencoder_kernel(%arg0: i32, %arg1: memref<16x16xf32, #tpu.memory_space<vmem>>, %arg2: memref<16x32xf32, #tpu.memory_space<vmem>>, %arg3: memref<1x32xf32, #tpu.memory_space<vmem>>, %arg4: memref<32x34xf32, #tpu.memory_space<vmem>>, %arg5: memref<1x34xf32, #tpu.memory_space<vmem>>, %arg6: memref<32x16xf32, #tpu.memory_space<vmem>>, %arg7: memref<1x16xf32, #tpu.memory_space<vmem>>, %arg8: memref<16x2xf32, #tpu.memory_space<vmem>>, %arg9: memref<16x16xf32, #tpu.memory_space<vmem>>) attributes {dimension_semantics = [#tpu.dimension_semantics<parallel>], iteration_bounds = array<i64: 1>, scalar_prefetch = 0 : i64, scratch_operands = 0 : i64, tpu.core_type = #tpu.core_type<tc>, window_params = [{transform_indices = @transform_0, window_bounds = array<i64: 16, 16>}, {pipeline_mode = #tpu.pipeline_mode<synchronous>, transform_indices = @transform_1, window_bounds = array<i64: 16, 32>}, {pipeline_mode = #tpu.pipeline_mode<synchronous>, transform_indices = @transform_2, window_bounds = array<i64: 1, 32>}, {pipeline_mode = #tpu.pipeline_mode<synchronous>, transform_indices = @transform_3, window_bounds = array<i64: 32, 34>}, {pipeline_mode = #tpu.pipeline_mode<synchronous>, transform_indices = @transform_4, window_bounds = array<i64: 1, 34>}, {pipeline_mode = #tpu.pipeline_mode<synchronous>, transform_indices = @transform_5, window_bounds = array<i64: 32, 16>}, {pipeline_mode = #tpu.pipeline_mode<synchronous>, transform_indices = @transform_6, window_bounds = array<i64: 1, 16>}, {transform_indices = @transform_7, window_bounds = array<i64: 16, 2>}, {transform_indices = @transform_8, window_bounds = array<i64: 16, 16>}]} {
    %c0 = arith.constant 0 : index
    %c0_0 = arith.constant 0 : index
    %0 = vector.load %arg1[%c0, %c0_0] : memref<16x16xf32, #tpu.memory_space<vmem>>, vector<16x16xf32>
    %c0_1 = arith.constant 0 : index
    %c0_2 = arith.constant 0 : index
    %1 = vector.load %arg2[%c0_1, %c0_2] : memref<16x32xf32, #tpu.memory_space<vmem>>, vector<16x32xf32>
    %cst = arith.constant dense<0.000000e+00> : vector<16x32xf32>
    %2 = tpu.matmul %0, %1, %cst {dimension_numbers = #tpu.dot_dimension_numbers<[1], [0], [0], [1], [0, 0, 1, 1], [], []>, precision = #tpu.contract_precision<fp32>} : vector<16x16xf32>, vector<16x32xf32>, vector<16x32xf32> -> vector<16x32xf32>
    %c0_3 = arith.constant 0 : index
    %c0_4 = arith.constant 0 : index
    %3 = vector.load %arg3[%c0_3, %c0_4] : memref<1x32xf32, #tpu.memory_space<vmem>>, vector<1x32xf32>
    %4 = vector.broadcast %3 : vector<1x32xf32> to vector<16x32xf32>
    %5 = arith.addf %2, %4 : vector<16x32xf32>
    %cst_5 = arith.constant 0.000000e+00 : f32
    %6 = vector.broadcast %cst_5 : f32 to vector<16x32xf32>
    %7 = arith.maximumf %5, %6 : vector<16x32xf32>
    %c0_6 = arith.constant 0 : index
    %c0_7 = arith.constant 0 : index
    %8 = vector.load %arg4[%c0_6, %c0_7] : memref<32x34xf32, #tpu.memory_space<vmem>>, vector<32x34xf32>
    %cst_8 = arith.constant dense<0.000000e+00> : vector<16x34xf32>
    %9 = tpu.matmul %7, %8, %cst_8 {dimension_numbers = #tpu.dot_dimension_numbers<[1], [0], [0], [1], [0, 0, 1, 1], [], []>, precision = #tpu.contract_precision<fp32>} : vector<16x32xf32>, vector<32x34xf32>, vector<16x34xf32> -> vector<16x34xf32>
    %c0_9 = arith.constant 0 : index
    %c0_10 = arith.constant 0 : index
    %10 = vector.load %arg5[%c0_9, %c0_10] : memref<1x34xf32, #tpu.memory_space<vmem>>, vector<1x34xf32>
    %11 = vector.broadcast %10 : vector<1x34xf32> to vector<16x34xf32>
    %12 = arith.addf %9, %11 : vector<16x34xf32>
    %13 = vector.extract_strided_slice %12 {offsets = [0, 32], sizes = [16, 2], strides = [1, 1]} : vector<16x34xf32> to vector<16x2xf32>
    %14 = vector.extract_strided_slice %12 {offsets = [0, 0], sizes = [16, 32], strides = [1, 1]} : vector<16x34xf32> to vector<16x32xf32>
    %cst_11 = arith.constant 0.000000e+00 : f32
    %15 = vector.broadcast %cst_11 : f32 to vector<16x32xf32>
    %16 = arith.maximumf %14, %15 : vector<16x32xf32>
    %c0_12 = arith.constant 0 : index
    %c0_13 = arith.constant 0 : index
    %17 = vector.load %arg6[%c0_12, %c0_13] : memref<32x16xf32, #tpu.memory_space<vmem>>, vector<32x16xf32>
    %cst_14 = arith.constant dense<0.000000e+00> : vector<16x16xf32>
    %18 = tpu.matmul %16, %17, %cst_14 {dimension_numbers = #tpu.dot_dimension_numbers<[1], [0], [0], [1], [0, 0, 1, 1], [], []>, precision = #tpu.contract_precision<fp32>} : vector<16x32xf32>, vector<32x16xf32>, vector<16x16xf32> -> vector<16x16xf32>
    %c0_15 = arith.constant 0 : index
    %c0_16 = arith.constant 0 : index
    %19 = vector.load %arg7[%c0_15, %c0_16] : memref<1x16xf32, #tpu.memory_space<vmem>>, vector<1x16xf32>
    %20 = vector.broadcast %19 : vector<1x16xf32> to vector<16x16xf32>
    %21 = arith.addf %18, %20 : vector<16x16xf32>
    %c0_17 = arith.constant 0 : index
    %c0_18 = arith.constant 0 : index
    %22 = vector.load %arg8[%c0_17, %c0_18] : memref<16x2xf32, #tpu.memory_space<vmem>>, vector<16x2xf32>
    tpu.vector_store %arg8[%c0_17, %c0_18], %13 {strides = array<i32>} : memref<16x2xf32, #tpu.memory_space<vmem>>, vector<16x2xf32>,
    %c0_19 = arith.constant 0 : index
    %c0_20 = arith.constant 0 : index
    %23 = vector.load %arg9[%c0_19, %c0_20] : memref<16x16xf32, #tpu.memory_space<vmem>>, vector<16x16xf32>
    tpu.vector_store %arg9[%c0_19, %c0_20], %21 {strides = array<i32>} : memref<16x16xf32, #tpu.memory_space<vmem>>, vector<16x16xf32>,
    return
  }
  func.func @transform_0(%arg0: i32) -> (i32, i32) {
    %c0_i32 = arith.constant 0 : i32
    %c0_i32_0 = arith.constant 0 : i32
    return %arg0, %c0_i32 : i32, i32
  }
  func.func @transform_1(%arg0: i32) -> (i32, i32) {
    %c0_i32 = arith.constant 0 : i32
    %c0_i32_0 = arith.constant 0 : i32
    %c0_i32_1 = arith.constant 0 : i32
    return %c0_i32, %c0_i32_0 : i32, i32
  }
  func.func @transform_2(%arg0: i32) -> (i32, i32) {
    %c0_i32 = arith.constant 0 : i32
    %c0_i32_0 = arith.constant 0 : i32
    %c0_i32_1 = arith.constant 0 : i32
    return %c0_i32, %c0_i32_0 : i32, i32
  }
  func.func @transform_3(%arg0: i32) -> (i32, i32) {
    %c0_i32 = arith.constant 0 : i32
    %c0_i32_0 = arith.constant 0 : i32
    %c0_i32_1 = arith.constant 0 : i32
    return %c0_i32, %c0_i32_0 : i32, i32
  }
  func.func @transform_4(%arg0: i32) -> (i32, i32) {
    %c0_i32 = arith.constant 0 : i32
    %c0_i32_0 = arith.constant 0 : i32
    %c0_i32_1 = arith.constant 0 : i32
    return %c0_i32, %c0_i32_0 : i32, i32
  }
  func.func @transform_5(%arg0: i32) -> (i32, i32) {
    %c0_i32 = arith.constant 0 : i32
    %c0_i32_0 = arith.constant 0 : i32
    %c0_i32_1 = arith.constant 0 : i32
    return %c0_i32, %c0_i32_0 : i32, i32
  }
  func.func @transform_6(%arg0: i32) -> (i32, i32) {
    %c0_i32 = arith.constant 0 : i32
    %c0_i32_0 = arith.constant 0 : i32
    %c0_i32_1 = arith.constant 0 : i32
    return %c0_i32, %c0_i32_0 : i32, i32
  }
  func.func @transform_7(%arg0: i32) -> (i32, i32) {
    %c0_i32 = arith.constant 0 : i32
    %c0_i32_0 = arith.constant 0 : i32
    return %arg0, %c0_i32 : i32, i32
  }
  func.func @transform_8(%arg0: i32) -> (i32, i32) {
    %c0_i32 = arith.constant 0 : i32
    %c0_i32_0 = arith.constant 0 : i32
    return %arg0, %c0_i32 : i32, i32
  }
}

</mosaic_0001>

<bundles_post_ra>
// kernel: tpu_custom_call.1
= control target key start
LH: loop header
LB: loop body
LE: loop exit
PB: predicated region body
PF: predicated region fallthrough
CT: control target
= control target key end

     0   :  { %14 = vsyncpa [#allocation3], 0  ;;  %s2323_s0 = inlined_call_operand.vmem [shape: f32[16,16], index: 0, kind: input, shape index: {}]   ;;  %s2324_s1 = inlined_call_operand.hbm [shape: f32[16,32], index: 1, kind: input, shape index: {}]   ;;  %s2325_s2 = inlined_call_operand.vmem [shape: f32[1,32], index: 2, kind: input, shape index: {}]   ;;  %s2326_s3 = inlined_call_operand.vmem [shape: f32[32,34], index: 3, kind: input, shape index: {}]   ;;  %s2327_s4 = inlined_call_operand.vmem [shape: f32[1,34], index: 4, kind: input, shape index: {}]   ;;  %s2328_s5 = inlined_call_operand.vmem [shape: f32[32,16], index: 5, kind: input, shape index: {}]   ;;  %s2329_s6 = inlined_call_operand.vmem [shape: f32[1,16], index: 6, kind: input, shape index: {}]   ;;  %s2330_s7 = inlined_call_operand.vmem [shape: f32[16,2], index: 7, kind: output, shape index: {0}]   ;;  %s2331_s8 = inlined_call_operand.hbm [shape: f32[16,16], index: 8, kind: output, shape index: {1}]  }
   0x1   :  { %15 = vsyncpa [#allocation4], 0  ;;  %s2174_s27 = smov [#allocation2]   ;;  %s2126_s9 = scalar_lea.hbm %s2324_s1, 256 }
   0x2   :  { %s23_s28 = sshll.u32 %s2174_s27, 4  ;;  %p2127_p0 = scmp.ne.s32.totalorder %s2324_s1, %s2126_s9  ;;  %s24_s28 = int_to_ptr.vmem [resolvable:$true] %s23_s28 }
   0x3   :  { %p2130_p1 = scmp.lt.u32.totalorder %s2126_s9, %s2324_s1 }
   0x5   :  { %p2132_p2 = pnand %p2130_p1, %p2127_p0 }
   0x7   :  { %2135 = shalt.err (!%p2132_p2)
}
   0x8   :  { %s2136_s14 = scalar_lea.vmem %s24_s28, 256  ;;  %p2141_p4 = scmp.lt.s32.totalorder %s24_s28, %s24_s28 }
   0x9   :  { %p2137_p3 = scmp.ne.s32.totalorder %s24_s28, %s2136_s14  ;;  %p2142_p5 = scmp.lt.s32.totalorder %s2136_s14, %s2136_s14 }
   0xb   :  { %p2143_p6 = por %p2142_p5, %p2141_p4 }
   0xd   :  { %p2144_p7 = pnand %p2143_p6, %p2137_p3 }
   0xf   :  { %2147 = shalt.err (!%p2144_p7)
}
  0x10   :  { %s2175_s15 = smov 128   ;;  %s2176_s16 = smov 8  }
  0x11   :  { %29 = dma.hbm_to_vmem [thread:$0]  %s2324_s1, 256, %s24_s28, [#allocation3], %s2175_s15, %s2175_s15, %s2176_s16  }
  0x12   :  { %2170 = dma.done.wait [#allocation3], 256  }
  0x13   :  { %2171 = vsyncadd [#allocation3], 4294967040  ;;  %vm54_vm0 = vcmask 130048   ;;  %v45_v0 = vld [vmem:[#allocation2] sm:$0xff]  ;;  %v46_v1 = vld [vmem:[#allocation2 + $0x8] sm:$0xff]  ;;  %vm576_vm1 = vcmask 261120  }
  0x14   :  { %v43_v2 = vld [vmem:[%s2323_s0] sm:$0xff]  ;;  %v62_v3 = vand.u32 4294901760, %v45_v0  ;;  %v65_v4 = vand.u32 4294901760, %v46_v1  ;;  %v44_v6 = vld [vmem:[%s2323_s0 + $0x8] sm:$0xff]  ;;  %v567_v37 = vld [vmem:[%s2326_s3 + $0x10] sm:$0xff]  ;;  %s2177_s18 = smov 96  }
  0x15   :  { %v56_v5 = vsel %vm54_vm0, %v43_v2, 0  ;;  %v59_v8 = vsel %vm54_vm0, %v44_v6, 0  ;;  %v565_v30 = vld [vmem:[%s2326_s3] sm:$0xff]  ;;  %v566_v31 = vld [vmem:[%s2326_s3 + $0x8] sm:$0xff]  ;;  %v568_v38 = vld [vmem:[%s2326_s3 + $0x18] sm:$0xff]  ;;  %v590_v39 = vand.u32 4294901760, %v567_v37 }
  0x16   :  { %v128_v7 = vand.u32 4294901760, %v56_v5  ;;  %v1965_v9 = vpack.c.bf16 %v65_v4, %v62_v3  ;;  %v150_v10 = vsub.f32 %v45_v0, %v62_v3  ;;  %v157_v11 = vsub.f32 %v46_v1, %v65_v4  ;;  %v1692_v0 = vld [vmem:[%s2325_s2] ss:$0 sm:$0xff]  ;;  %s2178_s1 = smov [#allocation5]  }
  0x17   :  { %v138_v12 = vand.u32 4294901760, %v59_v8  ;;  %v584_v32 = vand.u32 4294901760, %v565_v30  ;;  %v587_v33 = vand.u32 4294901760, %v566_v31  ;;  %v593_v40 = vand.u32 4294901760, %v568_v38  ;;  %s1678_s23 = sshll.u32 %s2178_s1, 4  ;;  %s1679_s23 = int_to_ptr.vmem [resolvable:$true] %s1678_s23 }
  0x18   :  { %1802 = vmatprep.mubr.f32.mxu0 %v128_v7  ;;  %v129_v13 = vsub.f32 %v56_v5, %v128_v7  ;;  %v151_v14 = vand.u32 4294901760, %v150_v10  ;;  %v158_v15 = vand.u32 4294901760, %v157_v11  ;;  %1966 = vmatprep.subr.bf16.mxu1 %v1965_v9  ;;  %v1973_v27 = vpack.c.bf16 %v157_v11, %v150_v10  ;;  %p2153_p9 = scmp.lt.s32.totalorder %s1679_s23, %s1679_s23 }
  0x19   :  { %v139_v16 = vsub.f32 %v59_v8, %v138_v12  ;;  %1968 = vmatpush3.bf16.msra.mxu1 %v1965_v9  ;;  %v2253_v34 = vpack.c.bf16 %v587_v33, %v584_v32  ;;  %v674_v35 = vsub.f32 %v565_v30, %v584_v32  ;;  %v681_v36 = vsub.f32 %v566_v31, %v587_v33 }
  0x1a   :  { %v130_v17 = vand.u32 4294901760, %v129_v13  ;;  %v152_v18 = vsub.f32 %v150_v10, %v151_v14  ;;  %v159_v19 = vsub.f32 %v157_v11, %v158_v15  ;;  %v1981_v29 = vpack.c.bf16 %v158_v15, %v151_v14 }
  0x1b   :  { %v140_v20 = vand.u32 4294901760, %v139_v16  ;;  %1990 = vmatprep.subr.bf16.mxu1 %v2253_v34  ;;  %v675_v41 = vand.u32 4294901760, %v674_v35  ;;  %v682_v42 = vand.u32 4294901760, %v681_v36  ;;  %v2263_v43 = vpack.c.bf16 %v593_v40, %v590_v39 }
  0x1c   :  { %v131_v21 = vsub.f32 %v129_v13, %v130_v17  ;;  %v153_v22 = vand.u32 4294901760, %v152_v18  ;;  %v160_v23 = vand.u32 4294901760, %v159_v19  ;;  %v688_v46 = vsub.f32 %v567_v37, %v590_v39 }
  0x1d   :  { %v141_v24 = vsub.f32 %v139_v16, %v140_v20  ;;  %v676_v44 = vsub.f32 %v674_v35, %v675_v41  ;;  %v683_v45 = vsub.f32 %v681_v36, %v682_v42  ;;  %v695_v47 = vsub.f32 %v568_v38, %v593_v40 }
  0x1e   :  { %v132_v25 = vand.u32 4294901760, %v131_v21  ;;  %v1969_v26 = vpack.c.bf16 %v160_v23, %v153_v22  ;;  %v689_v50 = vand.u32 4294901760, %v688_v46  ;;  %v2005_v58 = vpack.c.bf16 %v681_v36, %v674_v35  ;;  %v1113_v21 = vld [vmem:[%s2328_s5] sm:$0xff]  ;;  %v1114_v22 = vld [vmem:[%s2328_s5 + $0x8] sm:$0xff] }
  0x1f   :  { %v142_v28 = vand.u32 4294901760, %v141_v24  ;;  %v677_v48 = vand.u32 4294901760, %v676_v44  ;;  %v684_v49 = vand.u32 4294901760, %v683_v45  ;;  %v696_v51 = vand.u32 4294901760, %v695_v47 }
  0x20   :  { %1795 = vmatprep.mubr.f32.mxu1 %v132_v25  ;;  %1970 = vmatprep.subr.bf16.mxu0 %v1969_v26  ;;  %v690_v53 = vsub.f32 %v688_v46, %v689_v50  ;;  %v2009_v59 = vpack.c.bf16 %v695_v47, %v688_v46  ;;  %v2021_v60 = vpack.c.bf16 %v682_v42, %v675_v41  ;;  %v1131_v23 = vand.u32 4294901760, %v1113_v21 }
  0x21   :  { %1796 = vmatmul.mubr.f32.vlgmr.msra.gmra.mrb[0].mxu1 %v142_v28  ;;  %1972 = vmatpush3.bf16.msra.mxu0 %v1969_v26  ;;  %v1997_v52 = vpack.c.bf16 %v684_v49, %v677_v48  ;;  %v697_v54 = vsub.f32 %v695_v47, %v696_v51  ;;  %v2025_v61 = vpack.c.bf16 %v696_v51, %v689_v50  ;;  %v1134_v24 = vand.u32 4294901760, %v1114_v22  ;;  %v1116_v28 = vld [vmem:[%s2328_s5 + $0x18] sm:$0xff] }
  0x22   :  { %1974 = vmatprep.subr.bf16.mxu0 %v1973_v27  ;;  %1992 = vmatpush3.bf16.msra.mxu1 %v2253_v34  ;;  %v691_v55 = vand.u32 4294901760, %v690_v53  ;;  %v1221_v25 = vsub.f32 %v1113_v21, %v1131_v23  ;;  %v1140_v32 = vand.u32 4294901760, %v1116_v28  ;;  %v1693_v53 = vld [vmem:[%s2327_s4] ss:$0 sm:$0xff]  ;;  %vm1666_vm2 = vcmask 15360  }
  0x23   :  { %1994 = vmatprep.subr.bf16.mxu1 %v2263_v43  ;;  %v698_v56 = vand.u32 4294901760, %v697_v54  ;;  %v1228_v26 = vsub.f32 %v1114_v22, %v1134_v24  ;;  %v2037_v47 = vpack.c.bf16 %v1134_v24, %v1131_v23 }
  0x24   :  { %1803 = vmatmul.mubr.f32.vlgmr.msra.gmra.mrb[0].mxu0 %v138_v12  ;;  %v1242_v36 = vsub.f32 %v1116_v28, %v1140_v32 }
  0x25   :  { %1976 = vmatpush3.bf16.msra.mxu0 %v1973_v27  ;;  %1809 = vmatprep.mubr.f32.mxu0 %v129_v13  ;;  %v2001_v57 = vpack.c.bf16 %v698_v56, %v691_v55  ;;  %v1115_v27 = vld [vmem:[%s2328_s5 + $0x10] sm:$0xff]  ;;  %v1229_v30 = vand.u32 4294901760, %v1228_v26  ;;  %v2053_v49 = vpack.c.bf16 %v1228_v26, %v1221_v25 }
  0x26   :  { %1978 = vmatprep.subr.bf16.mxu0 %v1965_v9  ;;  %1996 = vmatpush3.bf16.msra.mxu1 %v2263_v43  ;;  %v1137_v31 = vand.u32 4294901760, %v1115_v27  ;;  %v1243_v40 = vand.u32 4294901760, %v1242_v36 }
  0x27   :  { %1998 = vmatprep.subr.bf16.mxu1 %v1997_v52 }
  0x28   :  { %v1235_v35 = vsub.f32 %v1115_v27, %v1137_v31  ;;  %v2041_v48 = vpack.c.bf16 %v1140_v32, %v1137_v31 }
  0x2a   :  { %v1236_v39 = vand.u32 4294901760, %v1235_v35  ;;  %v2057_v50 = vpack.c.bf16 %v1242_v36, %v1235_v35 }
  0x2c   :  { %1810 = vmatmul.mubr.f32.vlgmr.msra.gmra.mrb[0].mxu0 %v139_v16  ;;  %v1237_v42 = vsub.f32 %v1235_v35, %v1236_v39 }
  0x2d   :  { %1980 = vmatpush3.bf16.msra.mxu0 %v1965_v9  ;;  %1816 = vmatprep.mubr.f32.mxu0 %v130_v17 }
  0x2e   :  { %1982 = vmatprep.subr.bf16.mxu0 %v1981_v29  ;;  %v1238_v44 = vand.u32 4294901760, %v1237_v42 }
  0x34   :  { %1817 = vmatmul.mubr.f32.vlgmr.msra.gmra.mrb[0].mxu0 %v140_v20 }
  0x35   :  { %1984 = vmatpush3.bf16.msra.mxu0 %v1981_v29  ;;  %1823 = vmatprep.mubr.f32.mxu0 %v128_v7  ;;  %v1222_v29 = vand.u32 4294901760, %v1221_v25 }
  0x36   :  { %1986 = vmatprep.subr.bf16.mxu0 %v1965_v9 }
  0x37   :  { %v1223_v33 = vsub.f32 %v1221_v25, %v1222_v29  ;;  %v2069_v51 = vpack.c.bf16 %v1229_v30, %v1222_v29 }
  0x39   :  { %v1224_v37 = vand.u32 4294901760, %v1223_v33 }
  0x3c   :  { %1824 = vmatmul.mubr.f32.vlgmr.msra.gmra.mrb[0].mxu0 %v138_v12 }
  0x3d   :  { %1988 = vmatpush3.bf16.msra.mxu0 %v1965_v9  ;;  %1830 = vmatprep.mubr.f32.mxu0 %v128_v7 }
  0x44   :  { %1831 = vmatmul.mubr.f32.vlgmr.msra.gmra.mrb[0].mxu0 %v138_v12 }
  0xf4   :  { %v1797_v62 = vpop.f32.mrb[0].mxu1 }
  0xf5   :  { %v134_v63 = vpop.f32.mrb[1].mxu1  ;;  %v145_v1 = vadd.f32 %v1797_v62, %v1692_v0 }
  0xf6   :  { %v135_v2 = vadd.f32 %v1692_v0, %v134_v63 }
 0x117   :  { %v1832_v3 = vpop.f32.mrb[0].mxu0 }
 0x118   :  { %v2086_v4 = vadd.f32 %v1832_v3, %v145_v1  ;;  %v553_v5 = vpop.f32.mrb[1].mxu0 }
 0x119   :  { %v2088_v6 = vadd.f32 %v553_v5, %v135_v2 }
 0x11a   :  { %v564_v7 = vmax.f32 %v2086_v4, 0.0 }
 0x11b   :  { %v563_v8 = vmax.f32 %v2088_v6, 0.0 }
 0x11c   :  { %v581_v9 = vsel %vm576_vm1, %v564_v7, 0 }
 0x11d   :  { %v662_v10 = vand.u32 4294901760, %v581_v9  ;;  %v578_v11 = vsel %vm576_vm1, %v563_v8, 0 }
 0x11e   :  { %v652_v12 = vand.u32 4294901760, %v578_v11 }
 0x11f   :  { %v663_v13 = vsub.f32 %v581_v9, %v662_v10 }
 0x120   :  { %v653_v14 = vsub.f32 %v578_v11, %v652_v12 }
 0x121   :  { %v664_v15 = vand.u32 4294901760, %v663_v13 }
 0x122   :  { %v654_v16 = vand.u32 4294901760, %v653_v14 }
 0x123   :  { %v665_v17 = vsub.f32 %v663_v13, %v664_v15 }
 0x124   :  { %v655_v18 = vsub.f32 %v653_v14, %v654_v16 }
 0x125   :  { %v666_v20 = vand.u32 4294901760, %v665_v17 }
 0x126   :  { %v656_v19 = vand.u32 4294901760, %v655_v18 }
 0x128   :  { %1841 = vmatprep.mubr.f32.mxu1 %v656_v19 }
 0x129   :  { %1842 = vmatmul.mubr.f32.vlgmr.msra.gmra.mrb[2].mxu1 %v666_v20 }
 0x12a   :  { %2000 = vmatpush3.bf16.msra.mxu1 %v1997_v52  ;;  %1852 = vmatprep.mubr.f32.mxu1 %v652_v12  ;;  %v2073_v52 = vpack.c.bf16 %v1243_v40, %v1236_v39 }
 0x12b   :  { %2002 = vmatprep.subr.bf16.mxu1 %v2001_v57 }
 0x12e   :  { %2004 = vmatpush3.bf16.msra.mxu1 %v2001_v57 }
 0x12f   :  { %2006 = vmatprep.subr.bf16.mxu1 %v2005_v58 }
 0x131   :  { %1853 = vmatmul.mubr.f32.vlgmr.msra.gmra.mrb[2].mxu1 %v662_v10 }
 0x132   :  { %2008 = vmatpush3.bf16.msra.mxu1 %v2005_v58  ;;  %1863 = vmatprep.mubr.f32.mxu1 %v653_v14 }
 0x133   :  { %2010 = vmatprep.subr.bf16.mxu1 %v2009_v59 }
 0x136   :  { %2012 = vmatpush3.bf16.msra.mxu1 %v2009_v59 }
 0x137   :  { %2014 = vmatprep.subr.bf16.mxu1 %v2253_v34 }
 0x139   :  { %1864 = vmatmul.mubr.f32.vlgmr.msra.gmra.mrb[2].mxu1 %v663_v13 }
 0x13a   :  { %2016 = vmatpush3.bf16.msra.mxu1 %v2253_v34  ;;  %1874 = vmatprep.mubr.f32.mxu1 %v654_v16 }
 0x13b   :  { %2018 = vmatprep.subr.bf16.mxu1 %v2263_v43 }
 0x13e   :  { %2020 = vmatpush3.bf16.msra.mxu1 %v2263_v43 }
 0x13f   :  { %2022 = vmatprep.subr.bf16.mxu1 %v2021_v60 }
 0x141   :  { %1875 = vmatmul.mubr.f32.vlgmr.msra.gmra.mrb[2].mxu1 %v664_v15 }
 0x142   :  { %2024 = vmatpush3.bf16.msra.mxu1 %v2021_v60  ;;  %1885 = vmatprep.mubr.f32.mxu1 %v652_v12 }
 0x143   :  { %2026 = vmatprep.subr.bf16.mxu1 %v2025_v61 }
 0x146   :  { %2028 = vmatpush3.bf16.msra.mxu1 %v2025_v61 }
 0x147   :  { %2030 = vmatprep.subr.bf16.mxu1 %v2253_v34 }
 0x149   :  { %1886 = vmatmul.mubr.f32.vlgmr.msra.gmra.mrb[2].mxu1 %v662_v10 }
 0x14a   :  { %2032 = vmatpush3.bf16.msra.mxu1 %v2253_v34  ;;  %1896 = vmatprep.mubr.f32.mxu1 %v652_v12  ;;  %v1230_v34 = vsub.f32 %v1228_v26, %v1229_v30  ;;  %v1694_v12 = vld [vmem:[%s2329_s6] ss:$0 sm:$0xff] }
 0x14b   :  { %2034 = vmatprep.subr.bf16.mxu1 %v2263_v43 }
 0x14c   :  { %v1231_v38 = vand.u32 4294901760, %v1230_v34 }
 0x14e   :  { %2036 = vmatpush3.bf16.msra.mxu1 %v2263_v43  ;;  %v2045_v41 = vpack.c.bf16 %v1231_v38, %v1224_v37  ;;  %v1244_v43 = vsub.f32 %v1242_v36, %v1243_v40 }
 0x14f   :  { %2038 = vmatprep.subr.bf16.mxu1 %v2037_v47 }
 0x150   :  { %2046 = vmatprep.subr.bf16.mxu0 %v2045_v41  ;;  %v1245_v45 = vand.u32 4294901760, %v1244_v43 }
 0x151   :  { %1897 = vmatmul.mubr.f32.vlgmr.msra.gmra.mrb[2].mxu1 %v662_v10  ;;  %2048 = vmatpush3.bf16.msra.mxu0 %v2045_v41 }
 0x152   :  { %v2049_v46 = vpack.c.bf16 %v1245_v45, %v1238_v44  ;;  %2040 = vmatpush3.bf16.msra.mxu1 %v2037_v47 }
 0x153   :  { %2042 = vmatprep.subr.bf16.mxu1 %v2041_v48 }
 0x154   :  { %2050 = vmatprep.subr.bf16.mxu0 %v2049_v46 }
 0x155   :  { %2052 = vmatpush3.bf16.msra.mxu0 %v2049_v46 }
 0x156   :  { %2054 = vmatprep.subr.bf16.mxu0 %v2053_v49  ;;  %2044 = vmatpush3.bf16.msra.mxu1 %v2041_v48 }
 0x224   :  { %v1898_v54 = vpop.f32.mrb[2].mxu1 }
 0x225   :  { %v2089_v55 = vadd.f32 %v1898_v54, %v1693_v53  ;;  %v1101_v56 = vpop.f32.mrb[3].mxu1 }
 0x226   :  { %v2090_v57 = vadd.f32 %v1693_v53, %v1101_v56 }
 0x227   :  { %v1112_v58 = vmax.f32 %v2089_v55, 0.0 }
 0x228   :  { %v1111_v59 = vmax.f32 %v2090_v57, 0.0  ;;  %1660 = vrot.lane.b32.xlu0 %v2090_v57, %s2177_s18 }
 0x229   :  { %v1128_v60 = vsel %vm576_vm1, %v1112_v58, 0 }
 0x22a   :  { %v1209_v61 = vand.u32 4294901760, %v1128_v60  ;;  %v1125_v62 = vsel %vm576_vm1, %v1111_v59, 0 }
 0x22b   :  { %v1199_v63 = vand.u32 4294901760, %v1125_v62 }
 0x22c   :  { %v1210_v0 = vsub.f32 %v1128_v60, %v1209_v61  ;;  %1662 = vrot.lane.b32.xlu0 %v2089_v55, %s2177_s18 }
 0x22d   :  { %1918 = vmatprep.mubr.f32.mxu0 %v1199_v63  ;;  %v1200_v1 = vsub.f32 %v1125_v62, %v1199_v63 }
 0x22e   :  { %1919 = vmatmul.mubr.f32.vlgmr.msra.gmra.mrb[2].mxu0 %v1209_v61  ;;  %v1211_v2 = vand.u32 4294901760, %v1210_v0 }
 0x22f   :  { %2056 = vmatpush3.bf16.msra.mxu0 %v2053_v49  ;;  %1929 = vmatprep.mubr.f32.mxu0 %v1200_v1  ;;  %v1201_v3 = vand.u32 4294901760, %v1200_v1 }
 0x230   :  { %2058 = vmatprep.subr.bf16.mxu0 %v2057_v50  ;;  %v1212_v4 = vsub.f32 %v1210_v0, %v1211_v2 }
 0x231   :  { %v1202_v5 = vsub.f32 %v1200_v1, %v1201_v3 }
 0x232   :  { %v1213_v7 = vand.u32 4294901760, %v1212_v4 }
 0x233   :  { %2060 = vmatpush3.bf16.msra.mxu0 %v2057_v50  ;;  %v1203_v6 = vand.u32 4294901760, %v1202_v5 }
 0x234   :  { %2062 = vmatprep.subr.bf16.mxu0 %v2037_v47 }
 0x235   :  { %1907 = vmatprep.mubr.f32.mxu1 %v1203_v6 }
 0x236   :  { %1908 = vmatmul.mubr.f32.vlgmr.msra.gmra.mrb[4].mxu1 %v1213_v7  ;;  %1930 = vmatmul.mubr.f32.vlgmr.msra.gmra.mrb[2].mxu0 %v1210_v0 }
 0x237   :  { %2064 = vmatpush3.bf16.msra.mxu0 %v2037_v47  ;;  %1940 = vmatprep.mubr.f32.mxu0 %v1201_v3 }
 0x238   :  { %2066 = vmatprep.subr.bf16.mxu0 %v2041_v48 }
 0x23b   :  { %2068 = vmatpush3.bf16.msra.mxu0 %v2041_v48 }
 0x23c   :  { %2070 = vmatprep.subr.bf16.mxu0 %v2069_v51 }
 0x23e   :  { %1941 = vmatmul.mubr.f32.vlgmr.msra.gmra.mrb[2].mxu0 %v1211_v2 }
 0x23f   :  { %2072 = vmatpush3.bf16.msra.mxu0 %v2069_v51  ;;  %1951 = vmatprep.mubr.f32.mxu0 %v1199_v63 }
 0x240   :  { %2074 = vmatprep.subr.bf16.mxu0 %v2073_v52 }
 0x243   :  { %2076 = vmatpush3.bf16.msra.mxu0 %v2073_v52 }
 0x244   :  { %2078 = vmatprep.subr.bf16.mxu0 %v2037_v47 }
 0x246   :  { %1952 = vmatmul.mubr.f32.vlgmr.msra.gmra.mrb[2].mxu0 %v1209_v61 }
 0x247   :  { %2080 = vmatpush3.bf16.msra.mxu0 %v2037_v47  ;;  %1962 = vmatprep.mubr.f32.mxu0 %v1199_v63 }
 0x248   :  { %2082 = vmatprep.subr.bf16.mxu0 %v2041_v48 }
 0x24b   :  { %2084 = vmatpush3.bf16.msra.mxu0 %v2041_v48 }
 0x24e   :  { %1963 = vmatmul.mubr.f32.vlgmr.msra.gmra.mrb[2].mxu0 %v1209_v61 }
 0x29a   :  { %v1661_v8 = vpop.permute.xlu0 %1660 }
 0x29b   :  { %1667 = vst.msk [vmem:[%s2330_s7] sm:$0xff] %vm1666_vm2, %v1661_v8 }
 0x29e   :  { %v1663_v9 = vpop.permute.xlu0 %1662 }
 0x29f   :  { %1668 = vst.msk [vmem:[%s2330_s7 + $0x8] sm:$0xff] %vm1666_vm2, %v1663_v9  ;;  %s2148_s7 = scalar_lea.vmem %s1679_s23, 256 }
 0x2a0   :  { %p2149_p8 = scmp.ne.s32.totalorder %s1679_s23, %s2148_s7  ;;  %p2154_p10 = scmp.lt.s32.totalorder %s2148_s7, %s2148_s7 }
 0x2a2   :  { %p2155_p11 = por %p2154_p10, %p2153_p9 }
 0x2a4   :  { %p2156_p12 = pnand %p2155_p11, %p2149_p8 }
 0x309   :  { %v1909_v10 = vpop.f32.mrb[4].mxu1 }
 0x30a   :  { %v1205_v11 = vpop.f32.mrb[5].mxu1  ;;  %v1216_v13 = vadd.f32 %v1909_v10, %v1694_v12 }
 0x30b   :  { %v1206_v14 = vadd.f32 %v1694_v12, %v1205_v11 }
 0x321   :  { %v1964_v15 = vpop.f32.mrb[2].mxu0 }
 0x322   :  { %v2092_v16 = vadd.f32 %v1964_v15, %v1216_v13  ;;  %v1648_v17 = vpop.f32.mrb[3].mxu0 }
 0x323   :  { %v2094_v18 = vadd.f32 %v1648_v17, %v1206_v14 }
 0x324   :  { %1670 = vst.msk [vmem:[#allocation5 + $0x8] sm:$0xff] %vm54_vm0, %v2092_v16 }
 0x325   :  { %1669 = vst.msk [vmem:[#allocation5] sm:$0xff] %vm54_vm0, %v2094_v18 }
 0x326   :  { %2159 = shalt.err (!%p2156_p12)
}
 0x327   :  { %s2160_s25 = scalar_lea.hbm %s2331_s8, 256 }
 0x328   :  { %p2161_p13 = scmp.ne.s32.totalorder %s2331_s8, %s2160_s25  ;;  %p2164_p0 = scmp.lt.u32.totalorder %s2160_s25, %s2331_s8 }
 0x32a   :  { %p2166_p1 = pnand %p2164_p0, %p2161_p13 }
 0x32c   :  { %2169 = shalt.err (!%p2166_p1)
}
 0x32d   :  { %1684 = dma.vmem_to_hbm [thread:$0]  %s1679_s23, 256, %s2331_s8, [#allocation4], %s2175_s15, %s2175_s15, %s2176_s16  }
 0x32e   :  { %2172 = dma.done.wait [#allocation4], 256  }
 0x32f   :  { %2173 = vsyncadd [#allocation4], 4294967040 }
 0x330   :  { %1690 = vsyncpa [#allocation3], 1 }
 0x331   :  { %1691 = vsyncpa [#allocation4], 1 }

</bundles_post_ra>
